<compile_context>
chip_gen: v5e
topology: v5e:2x2
jax: 0.10.0
libtpu: 0.0.40
codegen_flags: <defaults>
</compile_context>

<pallas_src>
import functools

import jax
import jax.numpy as jnp
from jax.experimental import pallas as pl
from jax.experimental.pallas import tpu as pltpu

_EPS = 1e-8                          # torch F.cosine_similarity default eps
_SUBLANE = {4: 8, 2: 16, 1: 32}      # sublane multiple per dtype itemsize
_MAX_TILE_N = 32768                  # lanes; per-step DMA already amortized
_TARGET_STEP_BYTES = 2 << 20         # per-input per-step DMA target (batch blocking)


def _round_up(x, m):
    return ((x + m - 1) // m) * m


def _vmem_capacity_bytes():
    try:
        return int(pltpu.get_tpu_info().vmem_capacity_bytes)
    except Exception:
        return 0                     # unknown -> use the conservative config


def _per_lane_bytes(bt, c_pad, c_chunk_pad, itemsize):
    """VMEM bytes needed per lane column (per unit of tile_n) in one grid step."""
    inputs = 2 * 2 * bt * c_pad * itemsize      # 2 operands x double-buffered
    chunk_tmp = 3 * bt * c_chunk_pad * 4        # f32 casts + product temporaries
    accums = 3 * _round_up(bt, 8) * 4           # dot / ||p||^2 / ||t||^2 rows
    return inputs + chunk_tmp + accums


def _plan(B, C, HW, itemsize):
    """Pick (tile_n, batch_block, channel_chunk, vmem_limit) for this shape."""
    sub = _SUBLANE.get(itemsize, 8)
    c_pad = _round_up(C, sub)

    cap = _vmem_capacity_bytes()
    if cap >= (100 << 20):           # v5e / v6e: 128 MiB physical VMEM
        vmem_limit = 80 << 20
        budget = 48 << 20
    else:                            # v7x (64 MiB physical) or unknown
        vmem_limit = 48 << 20
        budget = 28 << 20

    # Channel chunking bounds the f32 temporary footprint for large C.
    c_chunk = C if c_pad <= 8 * sub else 4 * sub
    c_chunk_pad = _round_up(min(c_chunk, C), sub)
    hw_pad = _round_up(HW, 128)

    per_lane1 = _per_lane_bytes(1, c_pad, c_chunk_pad, itemsize)
    tile_n = min(budget // max(per_lane1, 1), _MAX_TILE_N, hw_pad)
    tile_n = max(128, (tile_n // 128) * 128)

    bt = 1
    if tile_n >= hw_pad and B > 1:
        # Whole spatial map fits in one tile -> block batches to amortize the
        # per-grid-step overhead (worst on v7x where the DMA finishes fastest).
        tile_n = hw_pad
        per_map = c_pad * hw_pad * itemsize     # one input, one batch row
        bt_cap = int(min(B, max(1, _TARGET_STEP_BYTES // max(per_map, 1))))
        for cand in range(bt_cap, 0, -1):       # largest divisor of B that fits
            if (B % cand == 0 and
                    _per_lane_bytes(cand, c_pad, c_chunk_pad, itemsize) * hw_pad
                    <= budget):
                bt = cand
                break

    return tile_n, bt, c_chunk, vmem_limit


def _cosine_loss_kernel(p_ref, t_ref, o_ref, *, hw, tile_n, tiles_per_seg,
                        c_chunk, need_mask):
    """Grid step (b, s, j): cosine loss over a (Bt, C, tile_n) tile, folded into
    a lane-dense (1, 128) partial-sum block accumulated into o_ref."""
    s = pl.program_id(1)
    j = pl.program_id(2)

    @pl.when(j == 0)
    def _():
        o_ref[...] = jnp.zeros_like(o_ref)

    bt, C = p_ref.shape[0], p_ref.shape[1]

    def accum(pc, tc, carry):
        dot, np2, nt2 = carry
        return (dot + jnp.sum(pc * tc, axis=1),
                np2 + jnp.sum(pc * pc, axis=1),
                nt2 + jnp.sum(tc * tc, axis=1))

    zeros = jnp.zeros((bt, tile_n), jnp.float32)
    carry = (zeros, zeros, zeros)

    if c_chunk >= C:
        # Small channel count: single shot over the whole block.
        carry = accum(p_ref[...].astype(jnp.float32),
                      t_ref[...].astype(jnp.float32), carry)
    else:
        # Large channel count: accumulate over channel chunks so the f32
        # temporaries stay small (bounded live ranges, less VMEM/vreg pressure).
        n_full, rem = divmod(C, c_chunk)

        def body(ci, carry):
            c0 = pl.multiple_of(ci * c_chunk, c_chunk)
            return accum(p_ref[:, pl.ds(c0, c_chunk), :].astype(jnp.float32),
                         t_ref[:, pl.ds(c0, c_chunk), :].astype(jnp.float32),
                         carry)

        carry = jax.lax.fori_loop(0, n_full, body, carry,
                                  unroll=True if n_full <= 8 else 8)
        if rem:
            c0 = n_full * c_chunk
            carry = accum(p_ref[:, pl.ds(c0, rem), :].astype(jnp.float32),
                          t_ref[:, pl.ds(c0, rem), :].astype(jnp.float32),
                          carry)

    dot, np2, nt2 = carry

    # cos = dot / (max(||p||, eps) * max(||t||, eps))
    #     = dot * rsqrt(max(||p||^2, eps^2)) * rsqrt(max(||t||^2, eps^2))
    # Per-norm clamping matches torch and avoids f32 overflow of np2 * nt2.
    eps2 = jnp.float32(_EPS * _EPS)
    cos = (dot
           * jax.lax.rsqrt(jnp.maximum(np2, eps2))
           * jax.lax.rsqrt(jnp.maximum(nt2, eps2)))
    loss = 1.0 - cos                                   # (bt, tile_n)

    if need_mask:
        # Mask AFTER cos: out-of-bounds lanes may hold garbage (even Inf/NaN),
        # but jnp.where/select discards them; keep the mask after the math.
        g = s * tiles_per_seg + j                      # global tile index
        lane = jax.lax.broadcasted_iota(jnp.int32, (bt, tile_n), 1)
        loss = jnp.where(g * tile_n + lane < hw, loss, 0.0)

    # Fold to lane-dense partials: (bt, tile_n) -> (bt*tile_n//128, 128) -> (1, 128)
    o_ref[...] += jnp.sum(loss.reshape(bt * tile_n // 128, 128),
                          axis=0, keepdims=True)


def cosine_similarity_loss(prediction, target, *, scale_factor=1.0,
                           reduction='mean', tile_n=None):
    """prediction/target: (B, C, *spatial) arrays. Cosine over dim=1."""
    assert prediction.shape == target.shape
    assert prediction.ndim >= 2
    B, C = prediction.shape[0], prediction.shape[1]
    HW = 1
    for d in prediction.shape[2:]:
        HW *= d
    N = B * HW                                         # number of loss elements

    if reduction not in ('mean', 'sum'):
        # TODO(synk): reduction='none' (per-position loss map) not implemented.
        raise NotImplementedError("only 'mean' and 'sum' reductions supported")

    itemsize = jnp.dtype(prediction.dtype).itemsize
    auto_tile_n, bt, c_chunk, vmem_limit = _plan(B, C, HW, itemsize)
    if tile_n is None:
        tile_n = auto_tile_n
    else:
        bt = 1
    assert tile_n % 128 == 0
    assert B % bt == 0

    # NCHW -> (B, C, HW) is a contiguous reshape (no HBM transpose copy).
    p3 = prediction.reshape(B, C, HW)
    t3 = target.reshape(B, C, HW)

    b_blocks = B // bt
    num_tiles = pl.cdiv(HW, tile_n)
    # Split the tile axis into 2 parallel segments when batch can't feed both
    # v7x TensorCores (harmless on single-core v5e/v6e).
    segs = 2 if (b_blocks == 1 and num_tiles >= 2) else 1
    tiles_per_seg = pl.cdiv(num_tiles, segs)
    need_mask = (segs * tiles_per_seg * tile_n) != HW

    if segs * tiles_per_seg > num_tiles:
        # Duplicated trailing tiles re-read the last valid tile; the in-kernel
        # mask (computed from the *unclamped* global index) zeroes them out.
        def tile_idx(s, j):
            return jnp.minimum(s * tiles_per_seg + j, num_tiles - 1)
    else:
        def tile_idx(s, j):
            return s * tiles_per_seg + j

    kernel = functools.partial(
        _cosine_loss_kernel, hw=HW, tile_n=tile_n, tiles_per_seg=tiles_per_seg,
        c_chunk=c_chunk, need_mask=need_mask)

    in_spec = pl.BlockSpec((bt, C, tile_n),
                           lambda b, s, j: (b, 0, tile_idx(s, j)))
    out_spec = pl.BlockSpec((None, 1, 128),
                            lambda b, s, j: (b * segs + s, 0, 0))

    partials = pl.pallas_call(
        kernel,
        out_shape=jax.ShapeDtypeStruct((b_blocks * segs, 1, 128), jnp.float32),
        grid_spec=pltpu.PrefetchScalarGridSpec(
            num_scalar_prefetch=0,
            grid=(b_blocks, segs, tiles_per_seg),
            in_specs=[in_spec, in_spec],
            out_specs=out_spec,
        ),
        compiler_params=pltpu.CompilerParams(
            dimension_semantics=("parallel", "parallel", "arbitrary"),
            vmem_limit_bytes=vmem_limit),
    )(p3, t3)

    total = jnp.sum(partials)                          # tiny reduce in XLA
    if reduction == 'mean':
        return total * (scale_factor / N)
    return total * scale_factor


def _reference(prediction, target, scale_factor=1.0, reduction='mean'):
    """Pure-JAX reference mirroring torch F.cosine_similarity semantics
    (per-norm eps clamping)."""
    p = prediction.astype(jnp.float32)
    t = target.astype(jnp.float32)
    dot = jnp.sum(p * t, axis=1)
    denom = (jnp.maximum(jnp.linalg.norm(p, axis=1), _EPS) *
             jnp.maximum(jnp.linalg.norm(t, axis=1), _EPS))
    loss = 1.0 - dot / denom
    if reduction == 'mean':
        loss = loss.mean()
    elif reduction == 'sum':
        loss = loss.sum()
    return loss * scale_factor


if __name__ == "__main__":
    key = jax.random.PRNGKey(0)
    k1, k2 = jax.random.split(key)

    # main check: B=2, C=4, H=W=16, mean reduction (batch-blocked path)
    B, C, H, W = 2, 4, 16, 16
    prediction = jax.random.normal(k1, (B, C, H, W), dtype=jnp.float32)
    target = jax.random.normal(k2, (B, C, H, W), dtype=jnp.float32)

    loss = cosine_similarity_loss(prediction, target, scale_factor=1.0,
                                  reduction='mean')
    loss = jax.block_until_ready(loss)
    ref = _reference(prediction, target, scale_factor=1.0, reduction='mean')
    assert jnp.allclose(loss, ref, rtol=1e-5, atol=1e-5), (loss, ref)

    # ragged spatial size (HW=81 < 128 -> masked tile) + sum reduction
    k3, k4 = jax.random.split(k1)
    p2 = jax.random.normal(k3, (2, 4, 9, 9), dtype=jnp.float32)
    t2 = jax.random.normal(k4, (2, 4, 9, 9), dtype=jnp.float32)
    loss2 = cosine_similarity_loss(p2, t2, scale_factor=2.5, reduction='sum')
    loss2 = jax.block_until_ready(loss2)
    ref2 = _reference(p2, t2, scale_factor=2.5, reduction='sum')
    assert jnp.allclose(loss2, ref2, rtol=1e-5, atol=1e-4), (loss2, ref2)

    # bf16, larger C, forced small tile_n: exercises channel-chunked
    # accumulation + 2-segment parallel split + clamped/masked trailing tiles.
    k5, k6 = jax.random.split(k2)
    p3 = jax.random.normal(k5, (1, 160, 24, 24), dtype=jnp.bfloat16)
    t3 = jax.random.normal(k6, (1, 160, 24, 24), dtype=jnp.bfloat16)
    loss3 = cosine_similarity_loss(p3, t3, scale_factor=1.0, reduction='mean',
                                   tile_n=128)
    loss3 = jax.block_until_ready(loss3)
    ref3 = _reference(p3, t3, scale_factor=1.0, reduction='mean')
    assert jnp.allclose(loss3, ref3, rtol=1e-4, atol=1e-4), (loss3, ref3)

    print("KERNEL_OK")
</pallas_src>

<mosaic_0001>
module attributes {stable_mosaic.version = 11 : i64} {
  func.func @_cosine_loss_kernel(%arg0: i32, %arg1: i32, %arg2: i32, %arg3: memref<2x4x256xf32, #tpu.memory_space<vmem>>, %arg4: memref<2x4x256xf32, #tpu.memory_space<vmem>>, %arg5: memref<1x1x128xf32, #tpu.memory_space<vmem>>) attributes {dimension_semantics = [#tpu.dimension_semantics<parallel>, #tpu.dimension_semantics<parallel>, #tpu.dimension_semantics<arbitrary>], iteration_bounds = array<i64: 1, 1, 1>, scalar_prefetch = 0 : i64, scratch_operands = 0 : i64, tpu.core_type = #tpu.core_type<tc>, window_params = [{transform_indices = @transform_0, window_bounds = array<i64: 2, 4, 256>}, {transform_indices = @transform_1, window_bounds = array<i64: 2, 4, 256>}, {transform_indices = @transform_2, window_bounds = array<i64: 1, 1, 128>}]} {
    %c0_i32 = arith.constant 0 : i32
    %0 = arith.cmpi eq, %arg2, %c0_i32 : i32
    %1 = arith.extui %0 : i1 to i32
    %c0_i32_0 = arith.constant 0 : i32
    %2 = arith.cmpi ne, %1, %c0_i32_0 : i32
    scf.if %2 {
      %cst_19 = arith.constant 0.000000e+00 : f32
      %34 = vector.broadcast %cst_19 : f32 to vector<1x128xf32>
      %c0_20 = arith.constant 0 : index
      %c0_21 = arith.constant 0 : index
      %c0_22 = arith.constant 0 : index
      %35 = vector.load %arg5[%c0_20, %c0_21, %c0_22] : memref<1x1x128xf32, #tpu.memory_space<vmem>>, vector<1x1x128xf32>
      %36 = vector.shape_cast %35 : vector<1x1x128xf32> to vector<1x128xf32>
      %37 = vector.shape_cast %34 : vector<1x128xf32> to vector<1x1x128xf32>
      tpu.vector_store %arg5[%c0_20, %c0_21, %c0_22], %37 {strides = array<i32>} : memref<1x1x128xf32, #tpu.memory_space<vmem>>, vector<1x1x128xf32>,
    } else {
    }
    %cst = arith.constant 0.000000e+00 : f32
    %3 = vector.broadcast %cst : f32 to vector<2x256xf32>
    %c0 = arith.constant 0 : index
    %c0_1 = arith.constant 0 : index
    %c0_2 = arith.constant 0 : index
    %4 = vector.load %arg3[%c0, %c0_1, %c0_2] : memref<2x4x256xf32, #tpu.memory_space<vmem>>, vector<2x4x256xf32>
    %c0_3 = arith.constant 0 : index
    %c0_4 = arith.constant 0 : index
    %c0_5 = arith.constant 0 : index
    %5 = vector.load %arg4[%c0_3, %c0_4, %c0_5] : memref<2x4x256xf32, #tpu.memory_space<vmem>>, vector<2x4x256xf32>
    %6 = arith.mulf %4, %5 : vector<2x4x256xf32>
    %cst_6 = arith.constant dense<0.000000e+00> : vector<2x256xf32>
    %7 = vector.multi_reduction <add>, %6, %cst_6 [1] : vector<2x4x256xf32> to vector<2x256xf32>
    %8 = arith.addf %3, %7 : vector<2x256xf32>
    %9 = arith.mulf %4, %4 : vector<2x4x256xf32>
    %cst_7 = arith.constant dense<0.000000e+00> : vector<2x256xf32>
    %10 = vector.multi_reduction <add>, %9, %cst_7 [1] : vector<2x4x256xf32> to vector<2x256xf32>
    %11 = arith.addf %3, %10 : vector<2x256xf32>
    %12 = arith.mulf %5, %5 : vector<2x4x256xf32>
    %cst_8 = arith.constant dense<0.000000e+00> : vector<2x256xf32>
    %13 = vector.multi_reduction <add>, %12, %cst_8 [1] : vector<2x4x256xf32> to vector<2x256xf32>
    %14 = arith.addf %3, %13 : vector<2x256xf32>
    %cst_9 = arith.constant 1.000000e-16 : f32
    %15 = vector.broadcast %cst_9 : f32 to vector<2x256xf32>
    %16 = arith.maximumf %11, %15 : vector<2x256xf32>
    %17 = math.rsqrt %16 : vector<2x256xf32>
    %18 = arith.mulf %8, %17 : vector<2x256xf32>
    %cst_10 = arith.constant 1.000000e-16 : f32
    %19 = vector.broadcast %cst_10 : f32 to vector<2x256xf32>
    %20 = arith.maximumf %14, %19 : vector<2x256xf32>
    %21 = math.rsqrt %20 : vector<2x256xf32>
    %22 = arith.mulf %18, %21 : vector<2x256xf32>
    %cst_11 = arith.constant 1.000000e+00 : f32
    %23 = vector.broadcast %cst_11 : f32 to vector<2x256xf32>
    %24 = arith.subf %23, %22 : vector<2x256xf32>
    %c0_12 = arith.constant 0 : index
    %c0_13 = arith.constant 0 : index
    %c0_14 = arith.constant 0 : index
    %25 = vector.load %arg5[%c0_12, %c0_13, %c0_14] : memref<1x1x128xf32, #tpu.memory_space<vmem>>, vector<1x1x128xf32>
    %26 = vector.shape_cast %25 : vector<1x1x128xf32> to vector<1x128xf32>
    %27 = vector.shape_cast %24 : vector<2x256xf32> to vector<4x128xf32>
    %cst_15 = arith.constant dense<0.000000e+00> : vector<128xf32>
    %28 = vector.multi_reduction <add>, %27, %cst_15 [0] : vector<4x128xf32> to vector<128xf32>
    %29 = vector.shape_cast %28 : vector<128xf32> to vector<1x128xf32>
    %30 = arith.addf %26, %29 : vector<1x128xf32>
    %c0_16 = arith.constant 0 : index
    %c0_17 = arith.constant 0 : index
    %c0_18 = arith.constant 0 : index
    %31 = vector.load %arg5[%c0_16, %c0_17, %c0_18] : memref<1x1x128xf32, #tpu.memory_space<vmem>>, vector<1x1x128xf32>
    %32 = vector.shape_cast %31 : vector<1x1x128xf32> to vector<1x128xf32>
    %33 = vector.shape_cast %30 : vector<1x128xf32> to vector<1x1x128xf32>
    tpu.vector_store %arg5[%c0_16, %c0_17, %c0_18], %33 {strides = array<i32>} : memref<1x1x128xf32, #tpu.memory_space<vmem>>, vector<1x1x128xf32>,
    return
  }
  func.func @transform_0(%arg0: i32, %arg1: i32, %arg2: i32) -> (i32, i32, i32) {
    %c1_i32 = arith.constant 1 : i32
    %0 = arith.muli %arg1, %c1_i32 : i32
    %1 = arith.addi %0, %arg2 : i32
    %c0_i32 = arith.constant 0 : i32
    %c0_i32_0 = arith.constant 0 : i32
    return %arg0, %c0_i32, %1 : i32, i32, i32
  }
  func.func @transform_1(%arg0: i32, %arg1: i32, %arg2: i32) -> (i32, i32, i32) {
    %c1_i32 = arith.constant 1 : i32
    %0 = arith.muli %arg1, %c1_i32 : i32
    %1 = arith.addi %0, %arg2 : i32
    %c0_i32 = arith.constant 0 : i32
    %c0_i32_0 = arith.constant 0 : i32
    return %arg0, %c0_i32, %1 : i32, i32, i32
  }
  func.func @transform_2(%arg0: i32, %arg1: i32, %arg2: i32) -> (i32, i32, i32) {
    %c1_i32 = arith.constant 1 : i32
    %0 = arith.muli %arg0, %c1_i32 : i32
    %1 = arith.addi %0, %arg1 : i32
    %c0_i32 = arith.constant 0 : i32
    %c0_i32_0 = arith.constant 0 : i32
    %c0_i32_1 = arith.constant 0 : i32
    return %1, %c0_i32, %c0_i32_0 : i32, i32, i32
  }
}

</mosaic_0001>

<bundles_post_ra>
// kernel: tpu_custom_call.1
= control target key start
LH: loop header
LB: loop body
LE: loop exit
PB: predicated region body
PF: predicated region fallthrough
CT: control target
= control target key end

     0   :  { %7 = vsyncpa [#allocation3], 0  ;;  %s649_s0 = inlined_call_operand.hbm [shape: f32[2,4,256], index: 0, kind: input, shape index: {}]   ;;  %s650_s1 = inlined_call_operand.hbm [shape: f32[2,4,256], index: 1, kind: input, shape index: {}]   ;;  %s651_s2 = inlined_call_operand.hbm [shape: f32[1,1,128], index: 2, kind: output, shape index: {}]  }
   0x1   :  { %8 = vsyncpa [#allocation6], 0 }
   0x2   :  { %9 = vsyncpa [#allocation4], 0  ;;  %s18_s11 = sshll.u32 %s649_s0, 4  ;;  %s457_s12 = smov [#allocation2]   ;;  %s19_s11 = int_to_ptr.hbm [resolvable:$true] %s18_s11 }
   0x3   :  { %s20_s13 = sshll.u32 %s457_s12, 4  ;;  %s35_s16 = sshll.u32 %s650_s1, 4  ;;  %s21_s13 = int_to_ptr.vmem [resolvable:$true] %s20_s13  ;;  %s36_s16 = int_to_ptr.hbm [resolvable:$true] %s35_s16 }
   0x4   :  { %s458_s17 = smov 128   ;;  %s459_s18 = smov 8  }
   0x5   :  { %26 = dma.hbm_to_vmem [thread:$0]  %s19_s11, 256, %s21_s13, [#allocation3], %s458_s17, %s458_s17, %s459_s18  }
   0x6   :  { %s460_s19 = smov [#allocation5]  }
   0x7   :  { %s37_s20 = sshll.u32 %s460_s19, 4  ;;  %s38_s20 = int_to_ptr.vmem [resolvable:$true] %s37_s20 }
   0x8   :  { %43 = dma.hbm_to_vmem [thread:$0]  %s36_s16, 256, %s38_s20, [#allocation6], %s458_s17, %s458_s17, %s459_s18  }
   0x9   :  { %451 = dma.done.wait [#allocation3], 256  }
   0xa   :  { %452 = vsyncadd [#allocation3], 4294967040 }
   0xb   :  { %453 = dma.done.wait [#allocation6], 256  }
   0xc   :  { %454 = vsyncadd [#allocation6], 4294967040  ;;  %v62_v0 = vld [vmem:[#allocation2] sm:$0xff]  ;;  %v64_v1 = vld [vmem:[#allocation5] sm:$0xff]  ;;  %vm81_vm0 = vcmask 1043456   ;;  %v461_v35 = vmov 0.0  }
   0xd   :  { %v63_v2 = vld [vmem:[#allocation2 + $0x8] sm:$0xff]  ;;  %v66_v3 = vmul.f32 %v64_v1, %v62_v0  ;;  %v65_v4 = vld [vmem:[#allocation5 + $0x8] sm:$0xff]  ;;  %v114_v6 = vmul.f32 %v62_v0, %v62_v0  ;;  %v161_v12 = vmul.f32 %v64_v1, %v64_v1  ;;  %61 = vst [vmem:[#allocation7] sm:$0x1] %v461_v35  ;;  %s463_s0 = smov [#allocation7]   ;;  %s345_s23 = sshll.u32 %s651_s2, 4  ;;  %s346_s23 = int_to_ptr.hbm [resolvable:$true] %s345_s23 }
   0xe   :  { %v67_v5 = vmul.f32 %v65_v4, %v63_v2  ;;  %v115_v7 = vmul.f32 %v63_v2, %v63_v2  ;;  %v162_v14 = vmul.f32 %v65_v4, %v65_v4  ;;  %s343_s1 = sshll.u32 %s463_s0, 4  ;;  %s344_s1 = int_to_ptr.vmem [resolvable:$true] %s343_s1 }
   0xf   :  { %70 = vst [vmem:[#allocation1] ss:$2 sm:$0xff] %v66_v3 }
  0x10   :  { %74 = vst [vmem:[#allocation1 + $0x10] ss:$2 sm:$0xff] %v67_v5 }
  0x16   :  { %v71_v8 = vld.sshfl [vmem:[#allocation1] sm:$0xff pattern:$0x75316420]  ;;  %v72_v9 = vld.sshfl [vmem:[#allocation1 + $0x8] sm:$0xff pattern:$0x75316420] }
  0x17   :  { %118 = vst [vmem:[#allocation1] ss:$2 sm:$0xff] %v114_v6  ;;  %v75_v10 = vld.sshfl [vmem:[#allocation1 + $0x10] sm:$0xff pattern:$0x75316420]  ;;  %v89_v18 = vsel %vm81_vm0, %v72_v9, 0.0 }
  0x18   :  { %v76_v11 = vld.sshfl [vmem:[#allocation1 + $0x18] sm:$0xff pattern:$0x75316420]  ;;  %v82_v23 = vsel %vm81_vm0, %v71_v8, 0.0  ;;  %v90_v27 = vrot.slane %v89_v18, 4  ;;  %v96_v37 = vsel %vm81_vm0, %v75_v10, 0.0 }
  0x19   :  { %122 = vst [vmem:[#allocation1 + $0x10] ss:$2 sm:$0xff] %v115_v7  ;;  %v83_v36 = vrot.slane %v82_v23, 4  ;;  %v103_v49 = vsel %vm81_vm0, %v76_v11, 0.0  ;;  %v97_v3 = vrot.slane %v96_v37, 4 }
  0x1a   :  { %v91_v40 = vadd.f32 %v90_v27, %v89_v18  ;;  %v104_v4 = vrot.slane %v103_v49, 4 }
  0x1e   :  { %v119_v13 = vld.sshfl [vmem:[#allocation1] sm:$0xff pattern:$0x75316420]  ;;  %v120_v15 = vld.sshfl [vmem:[#allocation1 + $0x8] sm:$0xff pattern:$0x75316420] }
  0x1f   :  { %v129_v16 = vsel %vm81_vm0, %v119_v13, 0.0  ;;  %165 = vst [vmem:[#allocation1] ss:$2 sm:$0xff] %v161_v12  ;;  %v136_v19 = vsel %vm81_vm0, %v120_v15, 0.0 }
  0x20   :  { %v130_v17 = vrot.slane %v129_v16, 4  ;;  %v123_v20 = vld.sshfl [vmem:[#allocation1 + $0x10] sm:$0xff pattern:$0x75316420]  ;;  %v137_v24 = vrot.slane %v136_v19, 4 }
  0x21   :  { %v124_v22 = vld.sshfl [vmem:[#allocation1 + $0x18] sm:$0xff pattern:$0x75316420]  ;;  %v143_v25 = vsel %vm81_vm0, %v123_v20, 0.0  ;;  %v92_v20 = vrot.slane %v91_v40, 2 }
  0x22   :  { %v131_v21 = vadd.f32 %v130_v17, %v129_v16  ;;  %v150_v26 = vsel %vm81_vm0, %v124_v22, 0.0  ;;  %169 = vst [vmem:[#allocation1 + $0x10] ss:$2 sm:$0xff] %v162_v14  ;;  %v144_v29 = vrot.slane %v143_v25, 4  ;;  %v138_v31 = vadd.f32 %v137_v24, %v136_v19 }
  0x23   :  { %v151_v30 = vrot.slane %v150_v26, 4  ;;  %v84_v14 = vadd.f32 %v83_v36, %v82_v23  ;;  %v98_v17 = vadd.f32 %v97_v3, %v96_v37 }
  0x24   :  { %v132_v28 = vrot.slane %v131_v21, 2  ;;  %v145_v33 = vadd.f32 %v144_v29, %v143_v25  ;;  %v139_v38 = vrot.slane %v138_v31, 2  ;;  %v105_v25 = vadd.f32 %v104_v4, %v103_v49 }
  0x25   :  { %v152_v34 = vadd.f32 %v151_v30, %v150_v26  ;;  %v99_v29 = vrot.slane %v98_v17, 2 }
  0x26   :  { %v133_v32 = vadd.f32 %v132_v28, %v131_v21  ;;  %v166_v39 = vld.sshfl [vmem:[#allocation1] sm:$0xff pattern:$0x75316420]  ;;  %v167_v42 = vld.sshfl [vmem:[#allocation1 + $0x8] sm:$0xff pattern:$0x75316420]  ;;  %v140_v45 = vadd.f32 %v139_v38, %v138_v31 }
  0x27   :  { %v176_v43 = vsel %vm81_vm0, %v166_v39, 0.0  ;;  %v146_v44 = vrot.slane %v145_v33, 2  ;;  %v183_v47 = vsel %vm81_vm0, %v167_v42, 0.0  ;;  %v153_v48 = vrot.slane %v152_v34, 2 }
  0x28   :  { %v134_v41 = vrot.slane %v133_v32, 1  ;;  %v177_v46 = vrot.slane %v176_v43, 4  ;;  %v184_v51 = vrot.slane %v183_v47, 4  ;;  %v141_v54 = vrot.slane %v140_v45, 1 }
  0x29   :  { %v147_v52 = vadd.f32 %v146_v44, %v145_v33  ;;  %v170_v53 = vld.sshfl [vmem:[#allocation1 + $0x10] sm:$0xff pattern:$0x75316420]  ;;  %v154_v56 = vadd.f32 %v153_v48, %v152_v34  ;;  %v171_v57 = vld.sshfl [vmem:[#allocation1 + $0x18] sm:$0xff pattern:$0x75316420]  ;;  %v93_v34 = vadd.f32 %v92_v20, %v91_v40 }
  0x2a   :  { %v135_v50 = vadd.f32 %v134_v41, %v133_v32  ;;  %v178_v55 = vadd.f32 %v177_v46, %v176_v43  ;;  %v190_v58 = vsel %vm81_vm0, %v170_v53, 0.0  ;;  %v185_v59 = vadd.f32 %v184_v51, %v183_v47 }
  0x2b   :  { %v148_v61 = vrot.slane %v147_v52, 1  ;;  %v191_v62 = vrot.slane %v190_v58, 4  ;;  %v142_v63 = vadd.f32 %v141_v54, %v140_v45  ;;  %v155_v1 = vrot.slane %v154_v56, 1 }
  0x2c   :  { %v496_v60 = vmax.f32 %v135_v50, 1e-16  ;;  %v179_v0 = vrot.slane %v178_v55, 2  ;;  %v197_v2 = vsel %vm81_vm0, %v171_v57, 0.0  ;;  %v186_v5 = vrot.slane %v185_v59, 2 }
  0x2d   :  { %v149_v6 = vadd.f32 %v148_v61, %v147_v52  ;;  %v499_v7 = vmax.f32 %v142_v63, 1e-16  ;;  %v156_v8 = vadd.f32 %v155_v1, %v154_v56  ;;  %v192_v9 = vadd.f32 %v191_v62, %v190_v58 }
  0x2e   :  { %v198_v10 = vrot.slane %v197_v2, 4  ;;  %v187_v11 = vadd.f32 %v186_v5, %v185_v59  ;;  %363 = vrsqrt.f32 %v496_v60  ;;  %v180_v13 = vadd.f32 %v179_v0, %v178_v55 }
  0x2f   :  { %v502_v12 = vmax.f32 %v149_v6, 1e-16  ;;  %365 = vrsqrt.f32 %v499_v7  ;;  %v193_v15 = vrot.slane %v192_v9, 2  ;;  %v505_v18 = vmax.f32 %v156_v8, 1e-16 }
  0x30   :  { %v199_v16 = vadd.f32 %v198_v10, %v197_v2  ;;  %v181_v19 = vrot.slane %v180_v13, 1  ;;  %v188_v22 = vrot.slane %v187_v11, 1  ;;  %v85_v33 = vrot.slane %v84_v14, 2 }
  0x31   :  { %367 = vrsqrt.f32 %v502_v12  ;;  %v194_v24 = vadd.f32 %v193_v15, %v192_v9  ;;  %v106_v38 = vrot.slane %v105_v25, 2  ;;  %v100_v45 = vadd.f32 %v99_v29, %v98_v17 }
  0x32   :  { %v200_v21 = vrot.slane %v199_v16, 2  ;;  %369 = vrsqrt.f32 %v505_v18  ;;  %v182_v26 = vadd.f32 %v181_v19, %v180_v13  ;;  %v189_v23 = vadd.f32 %v188_v22, %v187_v11 }
  0x33   :  { %v195_v30 = vrot.slane %v194_v24, 1  ;;  %v532_v48 = vadd.f32 %v85_v33, %v84_v14  ;;  %v94_v49 = vrot.slane %v93_v34, 1  ;;  %v537_v52 = vadd.f32 %v106_v38, %v105_v25 }
  0x34   :  { %v201_v27 = vadd.f32 %v200_v21, %v199_v16  ;;  %v509_v28 = vpop.eup %363  ;;  %v511_v31 = vmax.f32 %v182_v26, 1e-16  ;;  %v515_v36 = vmax.f32 %v189_v23, 1e-16  ;;  %v101_v59 = vrot.slane %v100_v45, 1 }
  0x35   :  { %v513_v32 = vpop.eup %365  ;;  %v196_v41 = vadd.f32 %v195_v30, %v194_v24  ;;  %v213_v42 = vmul.f32 %v509_v28, %v496_v60  ;;  %v87_v1 = vrot.slane %v532_v48, 1  ;;  %v95_v2 = vadd.f32 %v94_v49, %v93_v34 }
  0x36   :  { %v202_v35 = vrot.slane %v201_v27, 1  ;;  %v223_v39 = vmul.f32 %v513_v32, %v499_v7  ;;  %371 = vrsqrt.f32 %v511_v31  ;;  %v108_v3 = vrot.slane %v537_v52, 1 }
  0x37   :  { %v517_v37 = vpop.eup %367  ;;  %v529_v47 = vmax.f32 %v196_v41, 1e-16  ;;  %373 = vrsqrt.f32 %v515_v36  ;;  %v214_v55 = vmul.f32 %v509_v28, %v213_v42  ;;  %v102_v10 = vadd.f32 %v101_v59, %v100_v45 }
  0x38   :  { %v233_v43 = vmul.f32 %v517_v37, %v502_v12  ;;  %v203_v44 = vadd.f32 %v202_v35, %v201_v27  ;;  %v526_v40 = vpop.eup %369  ;;  %v224_v46 = vmul.f32 %v513_v32, %v223_v39  ;;  %vm218_vm1 = vweird.f32 %v496_v60 }
  0x39   :  { %v243_v51 = vmul.f32 %v526_v40, %v505_v18  ;;  %375 = vrsqrt.f32 %v529_v47  ;;  %v215_v4 = vmul.f32 0.5, %v214_v55  ;;  %vm228_vm2 = vweird.f32 %v499_v7 }
  0x3a   :  { %v234_v50 = vmul.f32 %v517_v37, %v233_v43  ;;  %v225_v53 = vmul.f32 0.5, %v224_v46  ;;  %v539_v54 = vmax.f32 %v203_v44, 1e-16  ;;  %vm238_vm3 = vweird.f32 %v502_v12 }
  0x3b   :  { %v244_v57 = vmul.f32 %v526_v40, %v243_v51  ;;  %vm229_vm4 = vweird.f32 %v513_v32  ;;  %vm219_vm5 = vweird.f32 %v509_v28  ;;  %vm248_vm6 = vweird.f32 %v505_v18 }
  0x3c   :  { %v235_v56 = vmul.f32 0.5, %v234_v50  ;;  %v544_v58 = vpop.eup %371  ;;  %377 = vrsqrt.f32 %v539_v54  ;;  %v226_v61 = vsub.f32 1.5, %v225_v53  ;;  %v216_v19 = vsub.f32 1.5, %v215_v4  ;;  %vm573_vm8 = vmor %vm228_vm2, %vm229_vm4 }
  0x3d   :  { %v245_v62 = vmul.f32 0.5, %v244_v57  ;;  %v261_v63 = vmul.f32 %v544_v58, %v511_v31  ;;  %v549_v0 = vpop.eup %373  ;;  %vm239_vm7 = vweird.f32 %v517_v37  ;;  %vm249_vm9 = vweird.f32 %v526_v40  ;;  %vm597_vm14 = vmor %vm218_vm1, %vm219_vm5 }
  0x3e   :  { %v236_v5 = vsub.f32 1.5, %v235_v56  ;;  %v271_v8 = vmul.f32 %v549_v0, %v515_v36  ;;  %v227_v11 = vmul.f32 %v513_v32, %v226_v61  ;;  %vm266_vm10 = vweird.f32 %v511_v31  ;;  %vm586_vm11 = vmor %vm238_vm3, %vm239_vm7 }
  0x3f   :  { %v262_v6 = vmul.f32 %v544_v58, %v261_v63  ;;  %v556_v9 = vpop.eup %375  ;;  %v246_v13 = vsub.f32 1.5, %v245_v62  ;;  %vm276_vm12 = vweird.f32 %v515_v36  ;;  %vm277_vm13 = vweird.f32 %v549_v0  ;;  %vm609_vm2 = vmor %vm248_vm6, %vm249_vm9 }
  0x40   :  { %v272_v16 = vmul.f32 %v549_v0, %v271_v8  ;;  %v281_v17 = vmul.f32 %v556_v9, %v529_v47  ;;  %v237_v20 = vmul.f32 %v517_v37, %v236_v5  ;;  %v231_v26 = vsel %vm573_vm8, %v513_v32, %v227_v11  ;;  %vm278_vm3 = vmor %vm276_vm12, %vm277_vm13 }
  0x41   :  { %v263_v14 = vmul.f32 0.5, %v262_v6  ;;  %v247_v27 = vmul.f32 %v526_v40, %v246_v13  ;;  %v217_v34 = vmul.f32 %v509_v28, %v216_v19  ;;  %vm267_vm15 = vweird.f32 %v544_v58 }
  0x42   :  { %v378_v15 = vpop.eup %377  ;;  %v273_v24 = vmul.f32 0.5, %v272_v16  ;;  %v282_v25 = vmul.f32 %v556_v9, %v281_v17  ;;  %v241_v12 = vsel %vm586_vm11, %v517_v37, %v237_v20  ;;  %v253_v60 = vmul.f32 %v231_v26, %v95_v2  ;;  %vm624_vm5 = vmor %vm266_vm10, %vm267_vm15  ;;  %v308_v16 = vld [vmem:[#allocation7] sm:$0x1] }
  0x43   :  { %v291_v21 = vmul.f32 %v378_v15, %v539_v54  ;;  %v264_v23 = vsub.f32 1.5, %v263_v14  ;;  %vm287_vm1 = vweird.f32 %v556_v9  ;;  %v251_v37 = vsel %vm609_vm2, %v526_v40, %v247_v27 }
  0x44   :  { %v274_v30 = vsub.f32 1.5, %v273_v24  ;;  %v283_v33 = vmul.f32 0.5, %v282_v25  ;;  %vm297_vm4 = vweird.f32 %v378_v15  ;;  %v109_v43 = vadd.f32 %v108_v3, %v537_v52 }
  0x45   :  { %v292_v29 = vmul.f32 %v378_v15, %v291_v21  ;;  %v265_v42 = vmul.f32 %v544_v58, %v264_v23  ;;  %vm286_vm6 = vweird.f32 %v529_v47  ;;  %v221_v36 = vsel %vm597_vm14, %v509_v28, %v217_v34 }
  0x46   :  { %v275_v39 = vmul.f32 %v549_v0, %v274_v30  ;;  %v284_v41 = vsub.f32 1.5, %v283_v33  ;;  %vm288_vm7 = vmor %vm286_vm6, %vm287_vm1  ;;  %vm296_vm8 = vweird.f32 %v539_v54  ;;  %v88_v31 = vadd.f32 %v87_v1, %v532_v48 }
  0x47   :  { %v293_v35 = vmul.f32 0.5, %v292_v29  ;;  %v254_v50 = vmul.f32 %v241_v12, %v102_v10  ;;  %v255_v51 = vmul.f32 %v251_v37, %v109_v43  ;;  %vm298_vm9 = vmor %vm296_vm8, %vm297_vm4  ;;  %v269_v47 = vsel %vm624_vm5, %v544_v58, %v265_v42 }
  0x48   :  { %v279_v45 = vsel %vm278_vm3, %v549_v0, %v275_v39  ;;  %v285_v46 = vmul.f32 %v556_v9, %v284_v41  ;;  %v252_v53 = vmul.f32 %v221_v36, %v88_v31  ;;  %v462_v61 = vmov 1935823168  }
  0x49   :  { %v294_v18 = vsub.f32 1.5, %v293_v35  ;;  %v301_v49 = vmul.f32 %v279_v45, %v253_v60  ;;  %v324_v62 = vunpack.c.l.s4 %v462_v61  ;;  %vm318_vm10 = vcmask 1041409  }
  0x4a   :  { %v289_v52 = vsel %vm288_vm7, %v556_v9, %v285_v46  ;;  %v300_v57 = vmul.f32 %v269_v47, %v252_v53  ;;  %vm320_vm11 = vcmask 1045509  }
  0x4b   :  { %v295_v40 = vmul.f32 %v378_v15, %v294_v18  ;;  %v302_v55 = vmul.f32 %v289_v52, %v254_v50  ;;  %v305_v54 = vsub.f32 1.0, %v301_v49  ;;  %v325_v4 = vunpack.c.0.s8 %v324_v62 }
  0x4c   :  { %v304_v1 = vsub.f32 1.0, %v300_v57 }
  0x4d   :  { %v299_v28 = vsel %vm298_vm9, %v378_v15, %v295_v40  ;;  %v306_v48 = vsub.f32 1.0, %v302_v55  ;;  %v313_v63 = vrot.slane %v305_v54, 4 }
  0x4e   :  { %v303_v56 = vmul.f32 %v299_v28, %v255_v51 }
  0x4f   :  { %v315_v58 = vsel %vm81_vm0, %v304_v1, %v313_v63 }
  0x50   :  { %v307_v59 = vsub.f32 1.0, %v303_v56 }
  0x52   :  { %v314_v0 = vrot.slane %v307_v59, 4 }
  0x54   :  { %v316_v2 = vsel %vm81_vm0, %v306_v48, %v314_v0 }
  0x55   :  { %v317_v3 = vrot.slane %v316_v2, 7 }
  0x57   :  { %v319_v5 = vsel %vm318_vm10, %v317_v3, %v315_v58 }
  0x58   :  { %v321_v6 = vsel %vm320_vm11, %v317_v3, %v319_v5 }
  0x59   :  { %v326_v8 = vperm.slane %v321_v6, %v325_v4 }
  0x5b   :  { %v327_v9 = vsel %vm81_vm0, %v326_v8, 0.0 }
  0x5c   :  { %v328_v10 = vrot.slane %v327_v9, 4 }
  0x5e   :  { %v329_v11 = vadd.f32 %v328_v10, %v327_v9 }
  0x60   :  { %v330_v13 = vrot.slane %v329_v11, 2 }
  0x62   :  { %v331_v14 = vadd.f32 %v330_v13, %v329_v11 }
  0x64   :  { %v332_v15 = vrot.slane %v331_v14, 1 }
  0x66   :  { %v333_v17 = vadd.f32 %v332_v15, %v331_v14 }
  0x68   :  { %v334_v19 = vadd.f32 %v333_v17, %v308_v16 }
  0x6a   :  { %335 = vst [vmem:[#allocation7] sm:$0x1] %v334_v19 }
  0x6b   :  { %348 = dma.vmem_to_hbm [thread:$0]  %s344_s1, 16, %s346_s23, [#allocation4]  }
  0x6c   :  { %455 = dma.done.wait [#allocation4], 16  }
  0x6d   :  { %456 = vsyncadd [#allocation4], 4294967280 }
  0x6e   :  { %353 = vsyncpa [#allocation3], 1 }
  0x6f   :  { %354 = vsyncpa [#allocation6], 1 }
  0x70   :  { %355 = vsyncpa [#allocation4], 1 }

</bundles_post_ra>
